<compile_context>
chip_gen: v7x
topology: tpu7x:2x2x1
jax: 0.10.0
libtpu: 0.0.40
codegen_flags: <defaults>
</compile_context>

<pallas_src>
import jax
import jax.numpy as jnp
from jax import lax
from jax.experimental import pallas as pl
from jax.experimental.pallas import tpu as pltpu


def _round_up(x, m):
    return ((x + m - 1) // m) * m


def _nll_kernel_single(pred_ref, tgt_ref, out_ref):
    # Specialized k == 1 path: whole (padded) class dim in one tile.
    # pred_ref: (TN, TC) native-dtype log-probs tile (VMEM)
    # tgt_ref : (TN, 1)  int32 class indices (VMEM), -1 for padded rows
    # out_ref : (8, 128) f32 per-row-tile partial-sum block (VMEM)
    pred = pred_ref[...].astype(jnp.float32)            # upcast on load only
    tgt = tgt_ref[...]                                   # (TN, 1) int32
    tn, tc = pred.shape

    col = lax.broadcasted_iota(jnp.int32, (tn, tc), 1)
    picked = jnp.where(col == tgt, pred, jnp.float32(0.0))
    # Per-row reduce on the MXU (idle otherwise); frees VALU/XLU slots.
    per_row = jnp.dot(picked, jnp.ones((tc, 1), jnp.float32),
                      preferred_element_type=jnp.float32)          # (TN, 1)
    total = jnp.sum(per_row)

    rr = lax.broadcasted_iota(jnp.int32, (8, 128), 0)
    cc = lax.broadcasted_iota(jnp.int32, (8, 128), 1)
    # Lane-dense unmasked store; partial sum lives at [0, 0], rest zeros.
    out_ref[...] = jnp.where((rr == 0) & (cc == 0), total, jnp.float32(0.0))


def _nll_kernel_multi(pred_ref, tgt_ref, out_ref, acc_ref):
    # General path: class dim split into k > 1 tiles, reduced into acc_ref.
    # acc_ref: (TN, 1) f32 per-row accumulator scratch (VMEM).
    j = pl.program_id(1)
    nk = pl.num_programs(1)

    @pl.when(j == 0)
    def _():
        acc_ref[...] = jnp.zeros_like(acc_ref)

    pred = pred_ref[...].astype(jnp.float32)            # upcast on load only
    tn, tc = pred.shape

    # Fold the class-tile offset into the (tn,1) target instead of the (tn,tc)
    # iota: saves one VPU add on every vreg of the tile.
    tgt_local = tgt_ref[...] - j * tc                    # (TN, 1) int32
    col = lax.broadcasted_iota(jnp.int32, (tn, tc), 1)
    picked = jnp.where(col == tgt_local, pred, jnp.float32(0.0))

    # Per-row reduce on the MXU into the resident accumulator.
    acc_ref[...] += jnp.dot(picked, jnp.ones((tc, 1), jnp.float32),
                            preferred_element_type=jnp.float32)

    @pl.when(j == nk - 1)
    def _():
        total = jnp.sum(acc_ref[...])                    # one scalar per row tile
        rr = lax.broadcasted_iota(jnp.int32, (8, 128), 0)
        cc = lax.broadcasted_iota(jnp.int32, (8, 128), 1)
        out_ref[...] = jnp.where((rr == 0) & (cc == 0), total, jnp.float32(0.0))


def nll_loss(pred, target, trans_feat=None, *, tn_max=1024, tc_max=4096):
    """Equivalent of F.nll_loss(pred, target) with reduction='mean'."""
    del trans_feat  # ignored, as in the PyTorch module
    n, c = pred.shape
    itemsize = jnp.dtype(pred.dtype).itemsize

    # Sublane granularity: 8 for 32-bit, 16 for bf16, 32 for int8/fp8.
    sub = 8 * max(1, 4 // itemsize)

    # --- class tiles: lane-dense, as wide as possible (full padded C if it fits)
    c_pad = _round_up(c, 128)
    tc = min(c_pad, tc_max)
    c_pad = _round_up(c_pad, tc)

    # --- row tiles: sublane-aligned, bounded by a ~1M-element tile budget
    max_tile_elems = 1 << 20                              # ~4 MiB per f32 tile
    tn_budget = max(sub, (max_tile_elems // tc) // sub * sub)
    n8 = _round_up(n, sub)
    tn = min(n8, _round_up(tn_max, sub), tn_budget)
    # Keep r >= 2 row tiles when N allows, so the 'parallel' axis can shard
    # across v7x's two TensorCores (grow tc, not tn, for bigger blocks).
    if n8 >= 2 * sub and n8 <= tn:
        tn = _round_up((n8 + 1) // 2, sub)
    n_pad = _round_up(n8, tn)

    tgt = target.astype(jnp.int32).reshape(n, 1)
    if n_pad != n:
        # Padded rows get target = -1 -> never matches any class column.
        tgt = jnp.pad(tgt, ((0, n_pad - n), (0, 0)), constant_values=-1)
    if (n_pad != n) or (c_pad != c):
        pred = jnp.pad(pred, ((0, n_pad - n), (0, c_pad - c)))

    r = n_pad // tn
    k = c_pad // tc

    # Right-size the VMEM limit from actual usage (+ headroom), not a blanket 48 MiB.
    tile_native = tn * tc * itemsize
    tile_f32 = tn * tc * 4
    vmem_need = 2 * tile_native + 3 * tile_f32 + 4 * tn * 4 + 2 * 8 * 128 * 4
    vmem_limit = min(max(int(vmem_need * 1.3) + (2 << 20), 8 << 20), 40 << 20)

    if k == 1:
        partial = pl.pallas_call(
            _nll_kernel_single,
            out_shape=jax.ShapeDtypeStruct((r * 8, 128), jnp.float32),
            grid=(r,),
            in_specs=[
                pl.BlockSpec((tn, tc), lambda i: (i, 0)),   # pred tile (native dtype)
                pl.BlockSpec((tn, 1), lambda i: (i, 0)),    # target rows
            ],
            out_specs=pl.BlockSpec((8, 128), lambda i: (i, 0)),
            compiler_params=pltpu.CompilerParams(
                dimension_semantics=("parallel",),
                vmem_limit_bytes=vmem_limit,
            ),
        )(pred, tgt)
    else:
        partial = pl.pallas_call(
            _nll_kernel_multi,
            out_shape=jax.ShapeDtypeStruct((r * 8, 128), jnp.float32),
            grid=(r, k),
            in_specs=[
                pl.BlockSpec((tn, tc), lambda i, j: (i, j)),   # pred tile (native dtype)
                pl.BlockSpec((tn, 1), lambda i, j: (i, 0)),    # target rows
            ],
            out_specs=pl.BlockSpec((8, 128), lambda i, j: (i, 0)),
            scratch_shapes=[pltpu.VMEM((tn, 1), jnp.float32)],
            compiler_params=pltpu.CompilerParams(
                # row-tile axis parallel (megacore-shardable), class reduction last/arbitrary
                dimension_semantics=("parallel", "arbitrary"),
                vmem_limit_bytes=vmem_limit,
            ),
        )(pred, tgt)

    # Tiny finalize in plain JAX: sum the per-row-tile partials, negate, mean.
    return -jnp.sum(partial) / jnp.float32(n)


if __name__ == "__main__":
    key = jax.random.PRNGKey(0)
    k1, k2, k3, k4 = jax.random.split(key, 4)

    # --- small case (single class tile, single row tile) ---
    N, C = 8, 32
    logits = jax.random.normal(k1, (N, C), dtype=jnp.float32)
    pred = jax.nn.log_softmax(logits, axis=-1)
    target = jax.random.randint(k2, (N,), 0, C, dtype=jnp.int32)

    loss = nll_loss(pred, target)
    jax.block_until_ready(loss)
    ref = -jnp.mean(pred[jnp.arange(N), target])
    assert jnp.allclose(loss, ref, atol=1e-6), (loss, ref)

    # --- larger case: 2 row tiles (v7x megacore path), padded rows/cols, bf16 input ---
    N2, C2 = 300, 200
    logits2 = jax.random.normal(k3, (N2, C2), dtype=jnp.float32)
    pred2 = jax.nn.log_softmax(logits2, axis=-1).astype(jnp.bfloat16)
    target2 = jax.random.randint(k4, (N2,), 0, C2, dtype=jnp.int32)

    loss2 = nll_loss(pred2, target2)
    jax.block_until_ready(loss2)
    ref2 = -jnp.mean(pred2.astype(jnp.float32)[jnp.arange(N2), target2])
    assert jnp.allclose(loss2, ref2, atol=1e-3), (loss2, ref2)

    # --- multi class-tile path (k > 1), exercised at small shapes via tc_max ---
    loss3 = nll_loss(pred2, target2, tc_max=128)
    jax.block_until_ready(loss3)
    assert jnp.allclose(loss3, ref2, atol=1e-3), (loss3, ref2)

    print("KERNEL_OK")
</pallas_src>

<mosaic_0001>
module attributes {stable_mosaic.version = 11 : i64} {
  func.func @_nll_kernel_single(%arg0: i32, %arg1: memref<8x128xf32, #tpu.memory_space<vmem>>, %arg2: memref<8x1xi32, #tpu.memory_space<vmem>>, %arg3: memref<8x128xf32, #tpu.memory_space<vmem>>) attributes {dimension_semantics = [#tpu.dimension_semantics<parallel>], iteration_bounds = array<i64: 1>, scalar_prefetch = 0 : i64, scratch_operands = 0 : i64, tpu.core_type = #tpu.core_type<tc>, window_params = [{transform_indices = @transform_0, window_bounds = array<i64: 8, 128>}, {transform_indices = @transform_1, window_bounds = array<i64: 8, 1>}, {transform_indices = @transform_2, window_bounds = array<i64: 8, 128>}]} {
    %c0 = arith.constant 0 : index
    %c0_0 = arith.constant 0 : index
    %0 = vector.load %arg1[%c0, %c0_0] : memref<8x128xf32, #tpu.memory_space<vmem>>, vector<8x128xf32>
    %c0_1 = arith.constant 0 : index
    %c0_2 = arith.constant 0 : index
    %1 = vector.load %arg2[%c0_1, %c0_2] : memref<8x1xi32, #tpu.memory_space<vmem>>, vector<8x1xi32>
    %2 = tpu.iota {dimensions = array<i32: 1>} : vector<8x128xi32>
    %3 = vector.broadcast %1 : vector<8x1xi32> to vector<8x128xi32>
    %4 = arith.cmpi eq, %2, %3 : vector<8x128xi32>
    %cst = arith.constant 0.000000e+00 : f32
    %5 = vector.broadcast %cst : f32 to vector<8x128xf32>
    %6 = arith.select %4, %0, %5 : vector<8x128xi1>, vector<8x128xf32>
    %cst_3 = arith.constant 1.000000e+00 : f32
    %7 = vector.broadcast %cst_3 : f32 to vector<128x1xf32>
    %cst_4 = arith.constant dense<0.000000e+00> : vector<8x1xf32>
    %8 = tpu.matmul %6, %7, %cst_4 {dimension_numbers = #tpu.dot_dimension_numbers<[1], [0], [0], [1], [0, 0, 1, 1], [], []>} : vector<8x128xf32>, vector<128x1xf32>, vector<8x1xf32> -> vector<8x1xf32>
    %9 = vector.shape_cast %8 : vector<8x1xf32> to vector<1x8x1xf32>
    %cst_5 = arith.constant dense<0.000000e+00> : vector<1xf32>
    %10 = vector.multi_reduction <add>, %9, %cst_5 [1, 2] : vector<1x8x1xf32> to vector<1xf32>
    %11 = vector.shape_cast %10 : vector<1xf32> to vector<1x1x1xf32>
    %12 = vector.extract %11[0, 0, 0] : f32 from vector<1x1x1xf32>
    %13 = tpu.iota {dimensions = array<i32: 0>} : vector<8x128xi32>
    %14 = tpu.iota {dimensions = array<i32: 1>} : vector<8x128xi32>
    %c0_i32 = arith.constant 0 : i32
    %15 = vector.broadcast %c0_i32 : i32 to vector<8x128xi32>
    %16 = arith.cmpi eq, %13, %15 : vector<8x128xi32>
    %c0_i32_6 = arith.constant 0 : i32
    %17 = vector.broadcast %c0_i32_6 : i32 to vector<8x128xi32>
    %18 = arith.cmpi eq, %14, %17 : vector<8x128xi32>
    %19 = arith.andi %16, %18 : vector<8x128xi1>
    %cst_7 = arith.constant 0.000000e+00 : f32
    %20 = vector.broadcast %12 : f32 to vector<8x128xf32>
    %21 = vector.broadcast %cst_7 : f32 to vector<8x128xf32>
    %22 = arith.select %19, %20, %21 : vector<8x128xi1>, vector<8x128xf32>
    %c0_8 = arith.constant 0 : index
    %c0_9 = arith.constant 0 : index
    %23 = vector.load %arg3[%c0_8, %c0_9] : memref<8x128xf32, #tpu.memory_space<vmem>>, vector<8x128xf32>
    tpu.vector_store %arg3[%c0_8, %c0_9], %22 {strides = array<i32>} : memref<8x128xf32, #tpu.memory_space<vmem>>, vector<8x128xf32>,
    return
  }
  func.func @transform_0(%arg0: i32) -> (i32, i32) {
    %c0_i32 = arith.constant 0 : i32
    %c0_i32_0 = arith.constant 0 : i32
    return %arg0, %c0_i32 : i32, i32
  }
  func.func @transform_1(%arg0: i32) -> (i32, i32) {
    %c0_i32 = arith.constant 0 : i32
    %c0_i32_0 = arith.constant 0 : i32
    return %arg0, %c0_i32 : i32, i32
  }
  func.func @transform_2(%arg0: i32) -> (i32, i32) {
    %c0_i32 = arith.constant 0 : i32
    %c0_i32_0 = arith.constant 0 : i32
    return %arg0, %c0_i32 : i32, i32
  }
}

</mosaic_0001>

<bundles_post_ra>
// kernel: tpu_custom_call.1
= control target key start
LH: loop header
LB: loop body
LE: loop exit
PB: predicated region body
PF: predicated region fallthrough
CT: control target
= control target key end

     0   :  { %v226_v1 = vmov 0   ;;  %v227_v2 = vmov 0.0|0.0   ;;  %s265_s0 = inlined_call_operand.vmem [shape: f32[8,128], index: 0, kind: input, shape index: {}]   ;;  %s266_s1 = inlined_call_operand.vmem [shape: s32[8,1], index: 1, kind: input, shape index: {}]   ;;  %s267_s2 = inlined_call_operand.hbm [shape: f32[8,128], index: 2, kind: output, shape index: {}]  }
   0x1   :  { %v13_v0 = vld [vmem:[%s266_s1] sm:$0xff]  ;;  %201 = vset.pattern.permute.xlu0 %v226_v1  ;;  %177 = vmatprep.subr.bf16.mxu0 %v227_v2 }
   0x2   :  { %7 = vsyncpa [#allocation3], 0  ;;  %17 = vperm.xlu0 %201, %v13_v0   ;;  %v228_v3 = vmov 1.0|1.0   ;;  %vm229_vm0 = vmmov 0   ;;  %v230_v4 = vmov 0.0   ;;  %v14_v5 = vlaneseq }
   0x3   :  { %178 = vmatpush3.bf16.msra.mxu0 %v228_v3  ;;  %174 = vmatprep.mubr.msk.f32.mxu0 %vm229_vm0, %v230_v4  ;;  %v12_v7 = vld [vmem:[%s265_s0] sm:$0xff]  ;;  %vm91_vm2 = vcmask 7168   ;;  %s231_s0 = smov [#allocation2]  }
   0x4   :  { %179 = vmatprep.subr.bf16.mxu0 %v227_v2  ;;  %v15_v6 = vand.u32 127, %v14_v5  ;;  %v103_v19 = vshrl.u32 %v14_v5, 7  ;;  %s116_s12 = sshll.u32 %s231_s0, 4  ;;  %s117_s12 = int_to_ptr.vmem [resolvable:$true] %s116_s12 }
   0x5   :  { %s202_s14 = scalar_lea.vmem %s117_s12, 128  ;;  %p207_p1 = scmp.lt.s32.totalorder %s117_s12, %s117_s12 }
   0x6   :  { %vm104_vm3 = vcmp.eq.s32.totalorder %v103_v19, 0  ;;  %vm105_vm4 = vcmp.eq.s32.totalorder %v15_v6, 0  ;;  %p203_p0 = scmp.ne.s32.totalorder %s117_s12, %s202_s14  ;;  %p208_p2 = scmp.lt.s32.totalorder %s202_s14, %s202_s14 }
   0x7   :  { %180 = vmatpush3.bf16.msra.mxu0 %v228_v3  ;;  %vm106_vm5 = vmand %vm104_vm3, %vm105_vm4 }
   0x8   :  { %181 = vmatprep.subr.bf16.mxu0 %v227_v2  ;;  %p209_p3 = por %p208_p2, %p207_p1 }
   0xa   :  { %p210_p4 = pnand %p209_p3, %p203_p0 }
   0xb   :  { %182 = vmatpush3.bf16.msra.mxu0 %v228_v3 }
   0xc   :  { %183 = vmatprep.subr.bf16.mxu0 %v227_v2 }
   0xf   :  { %184 = vmatpush3.bf16.msra.mxu0 %v228_v3 }
  0x10   :  { %185 = vmatprep.subr.bf16.mxu0 %v227_v2 }
  0x13   :  { %186 = vmatpush3.bf16.msra.mxu0 %v228_v3 }
  0x14   :  { %187 = vmatprep.subr.bf16.mxu0 %v227_v2 }
  0x17   :  { %188 = vmatpush3.bf16.msra.mxu0 %v228_v3 }
  0x18   :  { %189 = vmatprep.subr.bf16.mxu0 %v227_v2 }
  0x1b   :  { %190 = vmatpush3.bf16.msra.mxu0 %v228_v3 }
  0x1c   :  { %191 = vmatprep.subr.bf16.mxu0 %v227_v2 }
  0x1f   :  { %192 = vmatpush3.bf16.msra.mxu0 %v228_v3 }
  0x81   :  { %v18_v8 = vpop.permute.xlu0 %17 }
  0x82   :  { %vm19_vm1 = vcmp.eq.s32.totalorder %v15_v6, %v18_v8 }
  0x83   :  { %175 = vmatmul.mubr.msk.f32.vlgmr.msra.gmra.mrb[0].mxu0 %vm19_vm1, %v12_v7 }
 0x156   :  { %v87_v9 = vpop.f32.mrb[0].mxu0 }
 0x157   :  { %v176_v10 = vpop.f32.mrb[1].mxu0  ;;  %v92_v11 = vsel %vm91_vm2, %v87_v9, 0.0 }
 0x158   :  { %93 = vadd.xlane.f32.xlu0 %v92_v11 }
 0x1e5   :  { %v94_v12 = vpop.xlane.xlu0 %93 }
 0x1e6   :  { %v95_v13 = vrot.slane %v94_v12, 4 }
 0x1e8   :  { %v96_v14 = vadd.f32 %v95_v13, %v94_v12 }
 0x1ea   :  { %v97_v15 = vrot.slane %v96_v14, 2 }
 0x1ec   :  { %v98_v16 = vadd.f32 %v97_v15, %v96_v14 }
 0x1ee   :  { %v99_v17 = vrot.slane %v98_v16, 1 }
 0x1f0   :  { %v100_v18 = vadd.f32 %v99_v17, %v98_v16 }
 0x1f2   :  { %193 = vpush %v100_v18 }
 0x223   :  { %s194_s13 = spop %193 }
 0x224   :  { %v107_v20 = vstv %s194_s13 }
 0x225   :  { %v108_v21 = vsel %vm106_vm5, %v107_v20, 0.0 }
 0x226   :  { %109 = vst [vmem:[#allocation2] sm:$0xff] %v108_v21 }
 0x227   :  { %213 = shalt.err (!%p210_p4)
}
 0x228   :  { %s214_s17 = scalar_lea.hbm %s267_s2, 128 }
 0x229   :  { %p215_p5 = scmp.ne.s32.totalorder %s267_s2, %s214_s17  ;;  %p218_p6 = scmp.lt.u32.totalorder %s214_s17, %s267_s2 }
 0x22b   :  { %p220_p7 = pnand %p218_p6, %p215_p5 }
 0x22d   :  { %223 = shalt.err (!%p220_p7)
}
 0x22e   :  { %119 = dma.vmem_to_hbm [thread:$0]  %s117_s12, 128, %s267_s2, [#allocation3]  }
 0x22f   :  { %224 = dma.done.wait [#allocation3], 128  }
 0x230   :  { %225 = vsyncadd [#allocation3], 4294967168 }
 0x231   :  { %123 = vsyncpa [#allocation3], 1 }

</bundles_post_ra>
